<compile_context>
chip_gen: v6e
topology: v6e:2x2x1
jax: 0.10.0
libtpu: 0.0.40
codegen_flags: <defaults>
</compile_context>

<pallas_src>
import functools

import jax
import jax.numpy as jnp
from jax.experimental import pallas as pl
from jax.experimental.pallas import tpu as pltpu

EPS = 1e-5
_VMEM_LIMIT = 48 * 1024 * 1024  # explicit scoped-VMEM budget (fits v7x's 64 MiB)


def _layer_compiler_params():
    return pltpu.CompilerParams(
        dimension_semantics=("parallel",),   # batch grid axis -> megacore-shardable
        vmem_limit_bytes=_VMEM_LIMIT,
    )


# --------------------------- pass 1: conv + partial BN stats ---------------------------
def _conv_stats_kernel(x_ref, w_ref, b_ref, y_ref, s_ref, *, fold):
    """conv1d(k=3, pad=1) for one batch element + per-block BN partial statistics.

    x_ref : (1, L, Cin)    bf16  activation block (one batch element, full sequence)
    w_ref : (3*Cin, Cout)  bf16  folded conv taps  [w0; w1; w2]
    b_ref : (1, Cout)      f32   conv bias
    y_ref : (1, L, Cout)   bf16  raw (pre-BN) conv output
    s_ref : (1, 2, Cout)   f32   row0 = sum_L(y), row1 = sum_L((y - mean_L)^2)
    """
    x = x_ref[0]                                   # (L, Cin) bf16
    L, cin = x.shape
    xf = x.astype(jnp.float32)

    # k=3 halo inside the block: shift rows with pltpu.roll (XLU) and zero the wrapped row.
    row = jax.lax.broadcasted_iota(jnp.int32, (L, cin), 0)
    x_prev_f = jnp.where(row == 0, 0.0, pltpu.roll(xf, 1, 0))        # x[t-1], 0 at t=0
    x_next_f = jnp.where(row == L - 1, 0.0, pltpu.roll(xf, L - 1, 0))  # x[t+1], 0 at t=L-1

    if fold:
        # im2col on the lane axis: single K=3*Cin MXU matmul (better systolic fill).
        x3 = jnp.concatenate([x_prev_f, xf, x_next_f], axis=1).astype(x.dtype)  # (L, 3*Cin)
        acc = jnp.dot(x3, w_ref[...], preferred_element_type=jnp.float32)
    else:
        # Small Cin (stem): three tiny matmuls, f32 accumulation.
        acc = jnp.dot(x_prev_f.astype(x.dtype), w_ref[0:cin, :],
                      preferred_element_type=jnp.float32)
        acc = acc + jnp.dot(x, w_ref[cin:2 * cin, :],
                            preferred_element_type=jnp.float32)
        acc = acc + jnp.dot(x_next_f.astype(x.dtype), w_ref[2 * cin:3 * cin, :],
                            preferred_element_type=jnp.float32)

    acc = acc + b_ref[...]
    y = acc.astype(y_ref.dtype)                    # store pre-BN activations in bf16
    y_ref[0] = y

    # Per-block BN partial stats (centered -> numerically safe host combine).
    yf = y.astype(jnp.float32)
    s1 = jnp.sum(yf, axis=0, keepdims=True)        # (1, Cout)
    mloc = s1 * (1.0 / L)
    s2 = jnp.sum((yf - mloc) ** 2, axis=0, keepdims=True)
    s_ref[0, 0:1, :] = s1
    s_ref[0, 1:2, :] = s2


def conv_stats(x, w2, bias):
    """x: (B, L, Cin) bf16; w2: (3*Cin, Cout) bf16; bias: (Cout,) f32."""
    B, L, cin = x.shape
    cout = w2.shape[1]
    kernel = functools.partial(_conv_stats_kernel, fold=(cin % 128 == 0))
    y, stats = pl.pallas_call(
        kernel,
        grid=(B,),
        in_specs=[
            pl.BlockSpec((1, L, cin), lambda b: (b, 0, 0)),
            pl.BlockSpec((3 * cin, cout), lambda b: (0, 0)),
            pl.BlockSpec((1, cout), lambda b: (0, 0)),
        ],
        out_specs=[
            pl.BlockSpec((1, L, cout), lambda b: (b, 0, 0)),
            pl.BlockSpec((1, 2, cout), lambda b: (b, 0, 0)),
        ],
        out_shape=[
            jax.ShapeDtypeStruct((B, L, cout), jnp.bfloat16),
            jax.ShapeDtypeStruct((B, 2, cout), jnp.float32),
        ],
        compiler_params=_layer_compiler_params(),
    )(x, w2, bias.reshape(1, cout))
    return y, stats


# --------------------- pass 2: BN folded into FMA + residual + ReLU --------------------
def _bn_act_kernel(y_ref, sc_ref, sh_ref, o_ref):
    yf = y_ref[0].astype(jnp.float32)
    out = yf * sc_ref[...] + sh_ref[...]
    o_ref[0] = jnp.maximum(out, 0.0).astype(o_ref.dtype)


def _bn_act_res_kernel(y_ref, sc_ref, sh_ref, r_ref, o_ref):
    yf = y_ref[0].astype(jnp.float32)
    out = yf * sc_ref[...] + sh_ref[...] + r_ref[0].astype(jnp.float32)
    o_ref[0] = jnp.maximum(out, 0.0).astype(o_ref.dtype)


def bn_act(y, scale, shift, res=None):
    """y: (B, L, C) bf16; scale/shift: (C,) f32; res: optional (B, L, C) bf16."""
    B, L, c = y.shape
    act_spec = pl.BlockSpec((1, L, c), lambda b: (b, 0, 0))
    vec_spec = pl.BlockSpec((1, c), lambda b: (0, 0))
    out_shape = jax.ShapeDtypeStruct((B, L, c), jnp.bfloat16)
    if res is None:
        return pl.pallas_call(
            _bn_act_kernel,
            grid=(B,),
            in_specs=[act_spec, vec_spec, vec_spec],
            out_specs=act_spec,
            out_shape=out_shape,
            compiler_params=_layer_compiler_params(),
        )(y, scale.reshape(1, c), shift.reshape(1, c))
    return pl.pallas_call(
        _bn_act_res_kernel,
        grid=(B,),
        in_specs=[act_spec, vec_spec, vec_spec, act_spec],
        out_specs=act_spec,
        out_shape=out_shape,
        compiler_params=_layer_compiler_params(),
    )(y, scale.reshape(1, c), shift.reshape(1, c), res)


# -------------------------------- one conv+BN+ReLU layer -------------------------------
def conv_bn_relu_layer(x_bf16, w, b, gamma, beta, res=None, eps=EPS):
    """x: (B, L, Cin) bf16; w: (3, Cin, Cout) f32; b/gamma/beta: (Cout,) f32."""
    B, L, cin = x_bf16.shape
    cout = w.shape[2]
    w2 = w.astype(jnp.bfloat16).reshape(3 * cin, cout)

    y, stats = conv_stats(x_bf16, w2, b)

    # Combine per-block partial stats -> global training-mode BN stats (biased variance).
    n = B * L
    s1 = stats[:, 0, :]                                   # (B, C) per-block sums
    m_i = s1 / L                                          # per-block means
    mean = jnp.sum(s1, axis=0) / n                        # (C,)
    m2 = jnp.sum(stats[:, 1, :], axis=0) + L * jnp.sum((m_i - mean) ** 2, axis=0)
    var = m2 / n
    scale = gamma * jax.lax.rsqrt(var + eps)              # BN folded into one FMA
    shift = beta - mean * scale
    return bn_act(y, scale, shift, res)


# ----------------------------------- model (glue) --------------------------------------
def init_params(key, input_channels, base_channels, num_blocks):
    def conv_w(k, cin, cout):
        return 0.1 * jax.random.normal(k, (3, cin, cout), jnp.float32)

    def vec(k, c, offset=0.0, scale=0.05):
        return offset + scale * jax.random.normal(k, (c,), jnp.float32)

    keys = iter(jax.random.split(key, 4 + 8 * num_blocks))
    params = {
        "conv1_w": conv_w(next(keys), input_channels, base_channels),
        "conv1_b": vec(next(keys), base_channels),
        "bn1_g": vec(next(keys), base_channels, offset=1.0),
        "bn1_b": vec(next(keys), base_channels),
        "blocks": [],
    }
    for _ in range(num_blocks):
        params["blocks"].append({
            "w1": conv_w(next(keys), base_channels, base_channels),
            "b1": vec(next(keys), base_channels),
            "g1": vec(next(keys), base_channels, offset=1.0),
            "be1": vec(next(keys), base_channels),
            "w2": conv_w(next(keys), base_channels, base_channels),
            "b2": vec(next(keys), base_channels),
            "g2": vec(next(keys), base_channels, offset=1.0),
            "be2": vec(next(keys), base_channels),
        })
    return params


def resnet_forward(x, params):
    """x: (B, L, Cin) f32 (same layout as the PyTorch module input).
    Returns (B, C, L) f32, matching ResNet.forward's NCL output."""
    h = x.astype(jnp.bfloat16)                     # bf16 activations between layers
    h = conv_bn_relu_layer(h, params["conv1_w"], params["conv1_b"],
                           params["bn1_g"], params["bn1_b"], res=None)
    for blk in params["blocks"]:
        residual = h                               # in_channels == out_channels -> identity
        t = conv_bn_relu_layer(h, blk["w1"], blk["b1"], blk["g1"], blk["be1"], res=None)
        h = conv_bn_relu_layer(t, blk["w2"], blk["b2"], blk["g2"], blk["be2"], res=residual)
    return jnp.transpose(h.astype(jnp.float32), (0, 2, 1))


# --------------------------------- pure-JAX reference ----------------------------------
def ref_conv_bn_relu_layer(x_bf16, w, b, gamma, beta, res=None, eps=EPS):
    """Mirrors the kernel's precision policy (bf16 matmul operands, f32 accum/BN)."""
    B, L, _ = x_bf16.shape
    xf = x_bf16.astype(jnp.float32)
    wf = w.astype(jnp.bfloat16).astype(jnp.float32)
    xp = jnp.pad(xf, ((0, 0), (1, 1), (0, 0)))
    y = sum(jnp.einsum("blc,cd->bld", xp[:, k:k + L, :], wf[k],
                       precision=jax.lax.Precision.HIGHEST) for k in range(3)) + b
    y = y.astype(jnp.bfloat16).astype(jnp.float32)       # kernel stores pre-BN y in bf16
    mean = jnp.mean(y, axis=(0, 1))
    var = jnp.mean((y - mean) ** 2, axis=(0, 1))
    scale = gamma * jax.lax.rsqrt(var + eps)
    shift = beta - mean * scale
    out = y * scale + shift
    if res is not None:
        out = out + res.astype(jnp.float32)
    return jnp.maximum(out, 0.0).astype(jnp.bfloat16)


def ref_resnet_forward(x, params):
    h = x.astype(jnp.bfloat16)
    h = ref_conv_bn_relu_layer(h, params["conv1_w"], params["conv1_b"],
                               params["bn1_g"], params["bn1_b"])
    for blk in params["blocks"]:
        residual = h
        t = ref_conv_bn_relu_layer(h, blk["w1"], blk["b1"], blk["g1"], blk["be1"])
        h = ref_conv_bn_relu_layer(t, blk["w2"], blk["b2"], blk["g2"], blk["be2"],
                                   res=residual)
    return jnp.transpose(h.astype(jnp.float32), (0, 2, 1))


# ----------------------------------------- main -----------------------------------------
if __name__ == "__main__":
    # Small test shapes (original: B=32, L=5001, Cin=4, base_channels=128, 32 blocks).
    # base_channels=128 keeps the real lane width so the folded K=3*Cin path is exercised;
    # the Cin=4 stem exercises the small-K fallback path.
    B, L, Cin = 2, 16, 4
    base_channels = 128
    num_blocks = 2

    key = jax.random.PRNGKey(0)
    kx, kp = jax.random.split(key)
    x = jax.random.normal(kx, (B, L, Cin), jnp.float32)
    params = init_params(kp, Cin, base_channels, num_blocks)

    out = jax.block_until_ready(jax.jit(resnet_forward)(x, params))
    assert out.shape == (B, base_channels, L), out.shape

    ref = jax.block_until_ready(jax.jit(ref_resnet_forward)(x, params))
    max_err = float(jnp.max(jnp.abs(out - ref)))
    # Tolerance dominated by bf16 activation storage (identical policy in both paths).
    assert jnp.allclose(out, ref, atol=2e-2, rtol=2e-2), max_err

    print("KERNEL_OK")
</pallas_src>

<mosaic_0001>
module attributes {stable_mosaic.version = 11 : i64} {
  func.func @_conv_stats_kernel(%arg0: i32, %arg1: memref<1x16x4xbf16, #tpu.memory_space<vmem>>, %arg2: memref<12x128xbf16, #tpu.memory_space<vmem>>, %arg3: memref<1x128xf32, #tpu.memory_space<vmem>>, %arg4: memref<1x16x128xbf16, #tpu.memory_space<vmem>>, %arg5: memref<1x2x128xf32, #tpu.memory_space<vmem>>) attributes {dimension_semantics = [#tpu.dimension_semantics<parallel>], iteration_bounds = array<i64: 2>, scalar_prefetch = 0 : i64, scratch_operands = 0 : i64, tpu.core_type = #tpu.core_type<tc>, window_params = [{transform_indices = @transform_0, window_bounds = array<i64: 1, 16, 4>}, {pipeline_mode = #tpu.pipeline_mode<synchronous>, transform_indices = @transform_1, window_bounds = array<i64: 12, 128>}, {pipeline_mode = #tpu.pipeline_mode<synchronous>, transform_indices = @transform_2, window_bounds = array<i64: 1, 128>}, {transform_indices = @transform_3, window_bounds = array<i64: 1, 16, 128>}, {transform_indices = @transform_4, window_bounds = array<i64: 1, 2, 128>}]} {
    %c0 = arith.constant 0 : index
    %c0_0 = arith.constant 0 : index
    %c0_1 = arith.constant 0 : index
    %0 = vector.load %arg1[%c0, %c0_0, %c0_1] : memref<1x16x4xbf16, #tpu.memory_space<vmem>>, vector<1x16x4xbf16>
    %1 = vector.shape_cast %0 : vector<1x16x4xbf16> to vector<16x4xbf16>
    %2 = arith.extf %1 : vector<16x4xbf16> to vector<16x4xf32>
    %3 = tpu.iota {dimensions = array<i32: 0>} : vector<16x4xi32>
    %c0_i32 = arith.constant 0 : i32
    %4 = vector.broadcast %c0_i32 : i32 to vector<16x4xi32>
    %5 = arith.cmpi eq, %3, %4 : vector<16x4xi32>
    %c1_i32 = arith.constant 1 : i32
    %6 = tpu.dynamic_rotate %2 by %c1_i32 dim 0 : vector<16x4xf32>, i32 -> vector<16x4xf32>
    %cst = arith.constant 0.000000e+00 : f32
    %7 = vector.broadcast %cst : f32 to vector<16x4xf32>
    %8 = arith.select %5, %7, %6 : vector<16x4xi1>, vector<16x4xf32>
    %c15_i32 = arith.constant 15 : i32
    %9 = vector.broadcast %c15_i32 : i32 to vector<16x4xi32>
    %10 = arith.cmpi eq, %3, %9 : vector<16x4xi32>
    %c15_i32_2 = arith.constant 15 : i32
    %11 = tpu.dynamic_rotate %2 by %c15_i32_2 dim 0 : vector<16x4xf32>, i32 -> vector<16x4xf32>
    %cst_3 = arith.constant 0.000000e+00 : f32
    %12 = vector.broadcast %cst_3 : f32 to vector<16x4xf32>
    %13 = arith.select %10, %12, %11 : vector<16x4xi1>, vector<16x4xf32>
    %14 = arith.truncf %8 : vector<16x4xf32> to vector<16x4xbf16>
    %c0_4 = arith.constant 0 : index
    %c0_5 = arith.constant 0 : index
    %15 = vector.load %arg2[%c0_4, %c0_5] : memref<12x128xbf16, #tpu.memory_space<vmem>>, vector<4x128xbf16>
    %cst_6 = arith.constant dense<0.000000e+00> : vector<16x128xf32>
    %16 = tpu.matmul %14, %15, %cst_6 {dimension_numbers = #tpu.dot_dimension_numbers<[1], [0], [0], [1], [0, 0, 1, 1], [], []>} : vector<16x4xbf16>, vector<4x128xbf16>, vector<16x128xf32> -> vector<16x128xf32>
    %c4 = arith.constant 4 : index
    %c0_7 = arith.constant 0 : index
    %17 = vector.load %arg2[%c4, %c0_7] : memref<12x128xbf16, #tpu.memory_space<vmem>>, vector<4x128xbf16>
    %cst_8 = arith.constant dense<0.000000e+00> : vector<16x128xf32>
    %18 = tpu.matmul %1, %17, %cst_8 {dimension_numbers = #tpu.dot_dimension_numbers<[1], [0], [0], [1], [0, 0, 1, 1], [], []>} : vector<16x4xbf16>, vector<4x128xbf16>, vector<16x128xf32> -> vector<16x128xf32>
    %19 = arith.addf %16, %18 : vector<16x128xf32>
    %20 = arith.truncf %13 : vector<16x4xf32> to vector<16x4xbf16>
    %c8 = arith.constant 8 : index
    %c0_9 = arith.constant 0 : index
    %21 = vector.load %arg2[%c8, %c0_9] : memref<12x128xbf16, #tpu.memory_space<vmem>>, vector<4x128xbf16>
    %cst_10 = arith.constant dense<0.000000e+00> : vector<16x128xf32>
    %22 = tpu.matmul %20, %21, %cst_10 {dimension_numbers = #tpu.dot_dimension_numbers<[1], [0], [0], [1], [0, 0, 1, 1], [], []>} : vector<16x4xbf16>, vector<4x128xbf16>, vector<16x128xf32> -> vector<16x128xf32>
    %23 = arith.addf %19, %22 : vector<16x128xf32>
    %c0_11 = arith.constant 0 : index
    %c0_12 = arith.constant 0 : index
    %24 = vector.load %arg3[%c0_11, %c0_12] : memref<1x128xf32, #tpu.memory_space<vmem>>, vector<1x128xf32>
    %25 = vector.broadcast %24 : vector<1x128xf32> to vector<16x128xf32>
    %26 = arith.addf %23, %25 : vector<16x128xf32>
    %27 = arith.truncf %26 : vector<16x128xf32> to vector<16x128xbf16>
    %c0_13 = arith.constant 0 : index
    %c0_14 = arith.constant 0 : index
    %c0_15 = arith.constant 0 : index
    %28 = vector.load %arg4[%c0_13, %c0_14, %c0_15] : memref<1x16x128xbf16, #tpu.memory_space<vmem>>, vector<1x16x128xbf16>
    %29 = vector.shape_cast %28 : vector<1x16x128xbf16> to vector<16x128xbf16>
    %30 = vector.shape_cast %27 : vector<16x128xbf16> to vector<1x16x128xbf16>
    tpu.vector_store %arg4[%c0_13, %c0_14, %c0_15], %30 {strides = array<i32>} : memref<1x16x128xbf16, #tpu.memory_space<vmem>>, vector<1x16x128xbf16>,
    %31 = arith.extf %27 : vector<16x128xbf16> to vector<16x128xf32>
    %cst_16 = arith.constant dense<0.000000e+00> : vector<128xf32>
    %32 = vector.multi_reduction <add>, %31, %cst_16 [0] : vector<16x128xf32> to vector<128xf32>
    %33 = vector.shape_cast %32 : vector<128xf32> to vector<1x128xf32>
    %cst_17 = arith.constant 6.250000e-02 : f32
    %34 = vector.broadcast %cst_17 : f32 to vector<1x128xf32>
    %35 = arith.mulf %33, %34 : vector<1x128xf32>
    %36 = vector.broadcast %35 : vector<1x128xf32> to vector<16x128xf32>
    %37 = arith.subf %31, %36 : vector<16x128xf32>
    %38 = arith.mulf %37, %37 : vector<16x128xf32>
    %cst_18 = arith.constant dense<0.000000e+00> : vector<128xf32>
    %39 = vector.multi_reduction <add>, %38, %cst_18 [0] : vector<16x128xf32> to vector<128xf32>
    %40 = vector.shape_cast %39 : vector<128xf32> to vector<1x128xf32>
    %c0_19 = arith.constant 0 : index
    %c0_20 = arith.constant 0 : index
    %c0_21 = arith.constant 0 : index
    %41 = vector.load %arg5[%c0_19, %c0_20, %c0_21] : memref<1x2x128xf32, #tpu.memory_space<vmem>>, vector<1x1x128xf32>
    %42 = vector.shape_cast %41 : vector<1x1x128xf32> to vector<1x128xf32>
    %43 = vector.shape_cast %33 : vector<1x128xf32> to vector<1x1x128xf32>
    tpu.vector_store %arg5[%c0_19, %c0_20, %c0_21], %43 {strides = array<i32>} : memref<1x2x128xf32, #tpu.memory_space<vmem>>, vector<1x1x128xf32>,
    %c0_22 = arith.constant 0 : index
    %c1 = arith.constant 1 : index
    %c0_23 = arith.constant 0 : index
    %44 = vector.load %arg5[%c0_22, %c1, %c0_23] : memref<1x2x128xf32, #tpu.memory_space<vmem>>, vector<1x1x128xf32>
    %45 = vector.shape_cast %44 : vector<1x1x128xf32> to vector<1x128xf32>
    %46 = vector.shape_cast %40 : vector<1x128xf32> to vector<1x1x128xf32>
    tpu.vector_store %arg5[%c0_22, %c1, %c0_23], %46 {strides = array<i32>} : memref<1x2x128xf32, #tpu.memory_space<vmem>>, vector<1x1x128xf32>,
    return
  }
  func.func @transform_0(%arg0: i32) -> (i32, i32, i32) {
    %c0_i32 = arith.constant 0 : i32
    %c0_i32_0 = arith.constant 0 : i32
    %c0_i32_1 = arith.constant 0 : i32
    return %arg0, %c0_i32, %c0_i32_0 : i32, i32, i32
  }
  func.func @transform_1(%arg0: i32) -> (i32, i32) {
    %c0_i32 = arith.constant 0 : i32
    %c0_i32_0 = arith.constant 0 : i32
    %c0_i32_1 = arith.constant 0 : i32
    return %c0_i32, %c0_i32_0 : i32, i32
  }
  func.func @transform_2(%arg0: i32) -> (i32, i32) {
    %c0_i32 = arith.constant 0 : i32
    %c0_i32_0 = arith.constant 0 : i32
    %c0_i32_1 = arith.constant 0 : i32
    return %c0_i32, %c0_i32_0 : i32, i32
  }
  func.func @transform_3(%arg0: i32) -> (i32, i32, i32) {
    %c0_i32 = arith.constant 0 : i32
    %c0_i32_0 = arith.constant 0 : i32
    %c0_i32_1 = arith.constant 0 : i32
    return %arg0, %c0_i32, %c0_i32_0 : i32, i32, i32
  }
  func.func @transform_4(%arg0: i32) -> (i32, i32, i32) {
    %c0_i32 = arith.constant 0 : i32
    %c0_i32_0 = arith.constant 0 : i32
    %c0_i32_1 = arith.constant 0 : i32
    return %arg0, %c0_i32, %c0_i32_0 : i32, i32, i32
  }
}

module attributes {stable_mosaic.version = 11 : i64} {
  func.func @_bn_act_kernel(%arg0: i32, %arg1: memref<1x16x128xbf16, #tpu.memory_space<vmem>>, %arg2: memref<1x128xf32, #tpu.memory_space<vmem>>, %arg3: memref<1x128xf32, #tpu.memory_space<vmem>>, %arg4: memref<1x16x128xbf16, #tpu.memory_space<vmem>>) attributes {dimension_semantics = [#tpu.dimension_semantics<parallel>], iteration_bounds = array<i64: 2>, scalar_prefetch = 0 : i64, scratch_operands = 0 : i64, tpu.core_type = #tpu.core_type<tc>, window_params = [{transform_indices = @transform_0, window_bounds = array<i64: 1, 16, 128>}, {pipeline_mode = #tpu.pipeline_mode<synchronous>, transform_indices = @transform_1, window_bounds = array<i64: 1, 128>}, {pipeline_mode = #tpu.pipeline_mode<synchronous>, transform_indices = @transform_2, window_bounds = array<i64: 1, 128>}, {transform_indices = @transform_3, window_bounds = array<i64: 1, 16, 128>}]} {
    %c0 = arith.constant 0 : index
    %c0_0 = arith.constant 0 : index
    %c0_1 = arith.constant 0 : index
    %0 = vector.load %arg1[%c0, %c0_0, %c0_1] : memref<1x16x128xbf16, #tpu.memory_space<vmem>>, vector<1x16x128xbf16>
    %1 = vector.shape_cast %0 : vector<1x16x128xbf16> to vector<16x128xbf16>
    %2 = arith.extf %1 : vector<16x128xbf16> to vector<16x128xf32>
    %c0_2 = arith.constant 0 : index
    %c0_3 = arith.constant 0 : index
    %3 = vector.load %arg2[%c0_2, %c0_3] : memref<1x128xf32, #tpu.memory_space<vmem>>, vector<1x128xf32>
    %4 = vector.broadcast %3 : vector<1x128xf32> to vector<16x128xf32>
    %5 = arith.mulf %2, %4 : vector<16x128xf32>
    %c0_4 = arith.constant 0 : index
    %c0_5 = arith.constant 0 : index
    %6 = vector.load %arg3[%c0_4, %c0_5] : memref<1x128xf32, #tpu.memory_space<vmem>>, vector<1x128xf32>
    %7 = vector.broadcast %6 : vector<1x128xf32> to vector<16x128xf32>
    %8 = arith.addf %5, %7 : vector<16x128xf32>
    %cst = arith.constant 0.000000e+00 : f32
    %9 = vector.broadcast %cst : f32 to vector<16x128xf32>
    %10 = arith.maximumf %8, %9 : vector<16x128xf32>
    %11 = arith.truncf %10 : vector<16x128xf32> to vector<16x128xbf16>
    %c0_6 = arith.constant 0 : index
    %c0_7 = arith.constant 0 : index
    %c0_8 = arith.constant 0 : index
    %12 = vector.load %arg4[%c0_6, %c0_7, %c0_8] : memref<1x16x128xbf16, #tpu.memory_space<vmem>>, vector<1x16x128xbf16>
    %13 = vector.shape_cast %12 : vector<1x16x128xbf16> to vector<16x128xbf16>
    %14 = vector.shape_cast %11 : vector<16x128xbf16> to vector<1x16x128xbf16>
    tpu.vector_store %arg4[%c0_6, %c0_7, %c0_8], %14 {strides = array<i32>} : memref<1x16x128xbf16, #tpu.memory_space<vmem>>, vector<1x16x128xbf16>,
    return
  }
  func.func @transform_0(%arg0: i32) -> (i32, i32, i32) {
    %c0_i32 = arith.constant 0 : i32
    %c0_i32_0 = arith.constant 0 : i32
    %c0_i32_1 = arith.constant 0 : i32
    return %arg0, %c0_i32, %c0_i32_0 : i32, i32, i32
  }
  func.func @transform_1(%arg0: i32) -> (i32, i32) {
    %c0_i32 = arith.constant 0 : i32
    %c0_i32_0 = arith.constant 0 : i32
    %c0_i32_1 = arith.constant 0 : i32
    return %c0_i32, %c0_i32_0 : i32, i32
  }
  func.func @transform_2(%arg0: i32) -> (i32, i32) {
    %c0_i32 = arith.constant 0 : i32
    %c0_i32_0 = arith.constant 0 : i32
    %c0_i32_1 = arith.constant 0 : i32
    return %c0_i32, %c0_i32_0 : i32, i32
  }
  func.func @transform_3(%arg0: i32) -> (i32, i32, i32) {
    %c0_i32 = arith.constant 0 : i32
    %c0_i32_0 = arith.constant 0 : i32
    %c0_i32_1 = arith.constant 0 : i32
    return %arg0, %c0_i32, %c0_i32_0 : i32, i32, i32
  }
}

module attributes {stable_mosaic.version = 11 : i64} {
  func.func @_conv_stats_kernel(%arg0: i32, %arg1: memref<1x16x128xbf16, #tpu.memory_space<vmem>>, %arg2: memref<384x128xbf16, #tpu.memory_space<vmem>>, %arg3: memref<1x128xf32, #tpu.memory_space<vmem>>, %arg4: memref<1x16x128xbf16, #tpu.memory_space<vmem>>, %arg5: memref<1x2x128xf32, #tpu.memory_space<vmem>>) attributes {dimension_semantics = [#tpu.dimension_semantics<parallel>], iteration_bounds = array<i64: 2>, scalar_prefetch = 0 : i64, scratch_operands = 0 : i64, tpu.core_type = #tpu.core_type<tc>, window_params = [{transform_indices = @transform_0, window_bounds = array<i64: 1, 16, 128>}, {pipeline_mode = #tpu.pipeline_mode<synchronous>, transform_indices = @transform_1, window_bounds = array<i64: 384, 128>}, {pipeline_mode = #tpu.pipeline_mode<synchronous>, transform_indices = @transform_2, window_bounds = array<i64: 1, 128>}, {transform_indices = @transform_3, window_bounds = array<i64: 1, 16, 128>}, {transform_indices = @transform_4, window_bounds = array<i64: 1, 2, 128>}]} {
    %c0 = arith.constant 0 : index
    %c0_0 = arith.constant 0 : index
    %c0_1 = arith.constant 0 : index
    %0 = vector.load %arg1[%c0, %c0_0, %c0_1] : memref<1x16x128xbf16, #tpu.memory_space<vmem>>, vector<1x16x128xbf16>
    %1 = vector.shape_cast %0 : vector<1x16x128xbf16> to vector<16x128xbf16>
    %2 = arith.extf %1 : vector<16x128xbf16> to vector<16x128xf32>
    %3 = tpu.iota {dimensions = array<i32: 0>} : vector<16x128xi32>
    %c0_i32 = arith.constant 0 : i32
    %4 = vector.broadcast %c0_i32 : i32 to vector<16x128xi32>
    %5 = arith.cmpi eq, %3, %4 : vector<16x128xi32>
    %c1_i32 = arith.constant 1 : i32
    %6 = tpu.dynamic_rotate %2 by %c1_i32 dim 0 : vector<16x128xf32>, i32 -> vector<16x128xf32>
    %cst = arith.constant 0.000000e+00 : f32
    %7 = vector.broadcast %cst : f32 to vector<16x128xf32>
    %8 = arith.select %5, %7, %6 : vector<16x128xi1>, vector<16x128xf32>
    %c15_i32 = arith.constant 15 : i32
    %9 = vector.broadcast %c15_i32 : i32 to vector<16x128xi32>
    %10 = arith.cmpi eq, %3, %9 : vector<16x128xi32>
    %c15_i32_2 = arith.constant 15 : i32
    %11 = tpu.dynamic_rotate %2 by %c15_i32_2 dim 0 : vector<16x128xf32>, i32 -> vector<16x128xf32>
    %cst_3 = arith.constant 0.000000e+00 : f32
    %12 = vector.broadcast %cst_3 : f32 to vector<16x128xf32>
    %13 = arith.select %10, %12, %11 : vector<16x128xi1>, vector<16x128xf32>
    %14 = tpu.concatenate %8, %2, %13 in 1 : vector<16x128xf32>, vector<16x128xf32>, vector<16x128xf32> -> vector<16x384xf32>
    %15 = arith.truncf %14 : vector<16x384xf32> to vector<16x384xbf16>
    %c0_4 = arith.constant 0 : index
    %c0_5 = arith.constant 0 : index
    %16 = vector.load %arg2[%c0_4, %c0_5] : memref<384x128xbf16, #tpu.memory_space<vmem>>, vector<384x128xbf16>
    %cst_6 = arith.constant dense<0.000000e+00> : vector<16x128xf32>
    %17 = tpu.matmul %15, %16, %cst_6 {dimension_numbers = #tpu.dot_dimension_numbers<[1], [0], [0], [1], [0, 0, 1, 1], [], []>} : vector<16x384xbf16>, vector<384x128xbf16>, vector<16x128xf32> -> vector<16x128xf32>
    %c0_7 = arith.constant 0 : index
    %c0_8 = arith.constant 0 : index
    %18 = vector.load %arg3[%c0_7, %c0_8] : memref<1x128xf32, #tpu.memory_space<vmem>>, vector<1x128xf32>
    %19 = vector.broadcast %18 : vector<1x128xf32> to vector<16x128xf32>
    %20 = arith.addf %17, %19 : vector<16x128xf32>
    %21 = arith.truncf %20 : vector<16x128xf32> to vector<16x128xbf16>
    %c0_9 = arith.constant 0 : index
    %c0_10 = arith.constant 0 : index
    %c0_11 = arith.constant 0 : index
    %22 = vector.load %arg4[%c0_9, %c0_10, %c0_11] : memref<1x16x128xbf16, #tpu.memory_space<vmem>>, vector<1x16x128xbf16>
    %23 = vector.shape_cast %22 : vector<1x16x128xbf16> to vector<16x128xbf16>
    %24 = vector.shape_cast %21 : vector<16x128xbf16> to vector<1x16x128xbf16>
    tpu.vector_store %arg4[%c0_9, %c0_10, %c0_11], %24 {strides = array<i32>} : memref<1x16x128xbf16, #tpu.memory_space<vmem>>, vector<1x16x128xbf16>,
    %25 = arith.extf %21 : vector<16x128xbf16> to vector<16x128xf32>
    %cst_12 = arith.constant dense<0.000000e+00> : vector<128xf32>
    %26 = vector.multi_reduction <add>, %25, %cst_12 [0] : vector<16x128xf32> to vector<128xf32>
    %27 = vector.shape_cast %26 : vector<128xf32> to vector<1x128xf32>
    %cst_13 = arith.constant 6.250000e-02 : f32
    %28 = vector.broadcast %cst_13 : f32 to vector<1x128xf32>
    %29 = arith.mulf %27, %28 : vector<1x128xf32>
    %30 = vector.broadcast %29 : vector<1x128xf32> to vector<16x128xf32>
    %31 = arith.subf %25, %30 : vector<16x128xf32>
    %32 = arith.mulf %31, %31 : vector<16x128xf32>
    %cst_14 = arith.constant dense<0.000000e+00> : vector<128xf32>
    %33 = vector.multi_reduction <add>, %32, %cst_14 [0] : vector<16x128xf32> to vector<128xf32>
    %34 = vector.shape_cast %33 : vector<128xf32> to vector<1x128xf32>
    %c0_15 = arith.constant 0 : index
    %c0_16 = arith.constant 0 : index
    %c0_17 = arith.constant 0 : index
    %35 = vector.load %arg5[%c0_15, %c0_16, %c0_17] : memref<1x2x128xf32, #tpu.memory_space<vmem>>, vector<1x1x128xf32>
    %36 = vector.shape_cast %35 : vector<1x1x128xf32> to vector<1x128xf32>
    %37 = vector.shape_cast %27 : vector<1x128xf32> to vector<1x1x128xf32>
    tpu.vector_store %arg5[%c0_15, %c0_16, %c0_17], %37 {strides = array<i32>} : memref<1x2x128xf32, #tpu.memory_space<vmem>>, vector<1x1x128xf32>,
    %c0_18 = arith.constant 0 : index
    %c1 = arith.constant 1 : index
    %c0_19 = arith.constant 0 : index
    %38 = vector.load %arg5[%c0_18, %c1, %c0_19] : memref<1x2x128xf32, #tpu.memory_space<vmem>>, vector<1x1x128xf32>
    %39 = vector.shape_cast %38 : vector<1x1x128xf32> to vector<1x128xf32>
    %40 = vector.shape_cast %34 : vector<1x128xf32> to vector<1x1x128xf32>
    tpu.vector_store %arg5[%c0_18, %c1, %c0_19], %40 {strides = array<i32>} : memref<1x2x128xf32, #tpu.memory_space<vmem>>, vector<1x1x128xf32>,
    return
  }
  func.func @transform_0(%arg0: i32) -> (i32, i32, i32) {
    %c0_i32 = arith.constant 0 : i32
    %c0_i32_0 = arith.constant 0 : i32
    %c0_i32_1 = arith.constant 0 : i32
    return %arg0, %c0_i32, %c0_i32_0 : i32, i32, i32
  }
  func.func @transform_1(%arg0: i32) -> (i32, i32) {
    %c0_i32 = arith.constant 0 : i32
    %c0_i32_0 = arith.constant 0 : i32
    %c0_i32_1 = arith.constant 0 : i32
    return %c0_i32, %c0_i32_0 : i32, i32
  }
  func.func @transform_2(%arg0: i32) -> (i32, i32) {
    %c0_i32 = arith.constant 0 : i32
    %c0_i32_0 = arith.constant 0 : i32
    %c0_i32_1 = arith.constant 0 : i32
    return %c0_i32, %c0_i32_0 : i32, i32
  }
  func.func @transform_3(%arg0: i32) -> (i32, i32, i32) {
    %c0_i32 = arith.constant 0 : i32
    %c0_i32_0 = arith.constant 0 : i32
    %c0_i32_1 = arith.constant 0 : i32
    return %arg0, %c0_i32, %c0_i32_0 : i32, i32, i32
  }
  func.func @transform_4(%arg0: i32) -> (i32, i32, i32) {
    %c0_i32 = arith.constant 0 : i32
    %c0_i32_0 = arith.constant 0 : i32
    %c0_i32_1 = arith.constant 0 : i32
    return %arg0, %c0_i32, %c0_i32_0 : i32, i32, i32
  }
}

module attributes {stable_mosaic.version = 11 : i64} {
  func.func @_bn_act_res_kernel(%arg0: i32, %arg1: memref<1x16x128xbf16, #tpu.memory_space<vmem>>, %arg2: memref<1x128xf32, #tpu.memory_space<vmem>>, %arg3: memref<1x128xf32, #tpu.memory_space<vmem>>, %arg4: memref<1x16x128xbf16, #tpu.memory_space<vmem>>, %arg5: memref<1x16x128xbf16, #tpu.memory_space<vmem>>) attributes {dimension_semantics = [#tpu.dimension_semantics<parallel>], iteration_bounds = array<i64: 2>, scalar_prefetch = 0 : i64, scratch_operands = 0 : i64, tpu.core_type = #tpu.core_type<tc>, window_params = [{transform_indices = @transform_0, window_bounds = array<i64: 1, 16, 128>}, {pipeline_mode = #tpu.pipeline_mode<synchronous>, transform_indices = @transform_1, window_bounds = array<i64: 1, 128>}, {pipeline_mode = #tpu.pipeline_mode<synchronous>, transform_indices = @transform_2, window_bounds = array<i64: 1, 128>}, {transform_indices = @transform_3, window_bounds = array<i64: 1, 16, 128>}, {transform_indices = @transform_4, window_bounds = array<i64: 1, 16, 128>}]} {
    %c0 = arith.constant 0 : index
    %c0_0 = arith.constant 0 : index
    %c0_1 = arith.constant 0 : index
    %0 = vector.load %arg1[%c0, %c0_0, %c0_1] : memref<1x16x128xbf16, #tpu.memory_space<vmem>>, vector<1x16x128xbf16>
    %1 = vector.shape_cast %0 : vector<1x16x128xbf16> to vector<16x128xbf16>
    %2 = arith.extf %1 : vector<16x128xbf16> to vector<16x128xf32>
    %c0_2 = arith.constant 0 : index
    %c0_3 = arith.constant 0 : index
    %3 = vector.load %arg2[%c0_2, %c0_3] : memref<1x128xf32, #tpu.memory_space<vmem>>, vector<1x128xf32>
    %4 = vector.broadcast %3 : vector<1x128xf32> to vector<16x128xf32>
    %5 = arith.mulf %2, %4 : vector<16x128xf32>
    %c0_4 = arith.constant 0 : index
    %c0_5 = arith.constant 0 : index
    %6 = vector.load %arg3[%c0_4, %c0_5] : memref<1x128xf32, #tpu.memory_space<vmem>>, vector<1x128xf32>
    %7 = vector.broadcast %6 : vector<1x128xf32> to vector<16x128xf32>
    %8 = arith.addf %5, %7 : vector<16x128xf32>
    %c0_6 = arith.constant 0 : index
    %c0_7 = arith.constant 0 : index
    %c0_8 = arith.constant 0 : index
    %9 = vector.load %arg4[%c0_6, %c0_7, %c0_8] : memref<1x16x128xbf16, #tpu.memory_space<vmem>>, vector<1x16x128xbf16>
    %10 = vector.shape_cast %9 : vector<1x16x128xbf16> to vector<16x128xbf16>
    %11 = arith.extf %10 : vector<16x128xbf16> to vector<16x128xf32>
    %12 = arith.addf %8, %11 : vector<16x128xf32>
    %cst = arith.constant 0.000000e+00 : f32
    %13 = vector.broadcast %cst : f32 to vector<16x128xf32>
    %14 = arith.maximumf %12, %13 : vector<16x128xf32>
    %15 = arith.truncf %14 : vector<16x128xf32> to vector<16x128xbf16>
    %c0_9 = arith.constant 0 : index
    %c0_10 = arith.constant 0 : index
    %c0_11 = arith.constant 0 : index
    %16 = vector.load %arg5[%c0_9, %c0_10, %c0_11] : memref<1x16x128xbf16, #tpu.memory_space<vmem>>, vector<1x16x128xbf16>
    %17 = vector.shape_cast %16 : vector<1x16x128xbf16> to vector<16x128xbf16>
    %18 = vector.shape_cast %15 : vector<16x128xbf16> to vector<1x16x128xbf16>
    tpu.vector_store %arg5[%c0_9, %c0_10, %c0_11], %18 {strides = array<i32>} : memref<1x16x128xbf16, #tpu.memory_space<vmem>>, vector<1x16x128xbf16>,
    return
  }
  func.func @transform_0(%arg0: i32) -> (i32, i32, i32) {
    %c0_i32 = arith.constant 0 : i32
    %c0_i32_0 = arith.constant 0 : i32
    %c0_i32_1 = arith.constant 0 : i32
    return %arg0, %c0_i32, %c0_i32_0 : i32, i32, i32
  }
  func.func @transform_1(%arg0: i32) -> (i32, i32) {
    %c0_i32 = arith.constant 0 : i32
    %c0_i32_0 = arith.constant 0 : i32
    %c0_i32_1 = arith.constant 0 : i32
    return %c0_i32, %c0_i32_0 : i32, i32
  }
  func.func @transform_2(%arg0: i32) -> (i32, i32) {
    %c0_i32 = arith.constant 0 : i32
    %c0_i32_0 = arith.constant 0 : i32
    %c0_i32_1 = arith.constant 0 : i32
    return %c0_i32, %c0_i32_0 : i32, i32
  }
  func.func @transform_3(%arg0: i32) -> (i32, i32, i32) {
    %c0_i32 = arith.constant 0 : i32
    %c0_i32_0 = arith.constant 0 : i32
    %c0_i32_1 = arith.constant 0 : i32
    return %arg0, %c0_i32, %c0_i32_0 : i32, i32, i32
  }
  func.func @transform_4(%arg0: i32) -> (i32, i32, i32) {
    %c0_i32 = arith.constant 0 : i32
    %c0_i32_0 = arith.constant 0 : i32
    %c0_i32_1 = arith.constant 0 : i32
    return %arg0, %c0_i32, %c0_i32_0 : i32, i32, i32
  }
}

</mosaic_0001>

<bundles_post_ra>
// kernel: resnet_forward.11
= control target key start
LH: loop header
LB: loop body
LE: loop exit
PB: predicated region body
PF: predicated region fallthrough
CT: control target
= control target key end

     0   :  { %s324_s12 = smov 0   ;;  %s341_s0 = inlined_call_operand.vmem [shape: bf16[2,16,128], index: 0, kind: input, shape index: {}]   ;;  %s342_s1 = inlined_call_operand.vmem [shape: f32[1,128], index: 1, kind: input, shape index: {}]   ;;  %s343_s2 = inlined_call_operand.vmem [shape: f32[1,128], index: 2, kind: input, shape index: {}]   ;;  %s344_s3 = inlined_call_operand.vmem [shape: bf16[2,16,128], index: 3, kind: output, shape index: {}]  }
   0x1 LB: > { %s260_s13 = sadd.s32 4294967295, %s302_s12   ;;  %p264_p0 = scmp.ge.s32.totalorder %s302_s12, 1  ;;  %s302_s12 = sphi %s324_s12, %s13_s12  }
   0x2   : > { %p137_p1 = scmp.lt.s32.totalorder %s302_s12, 3 }
   0x4   : > { %p138_p2 = pnand %p264_p0, %p137_p1 }
   0x5   : > { %p161_p3 = scmp.lt.s32.totalorder (!%p138_p2), %s260_s13, 1 }
   0x6   : > { %141 = sbr.rel (%p138_p2) target bundleno = 26 (0x1a), region = 32 }
   0xb   : > { %s346_s13 = smov (!%p161_p3, %s260_s13), 1  ;;  %v269_v1 = vld [vmem:[%s342_s1] ss:$0 sm:$0xff] }
   0xc   : > { %s275_s14 = sshll.u32 %s346_s13, 3  ;;  %v270_v4 = vld [vmem:[%s343_s2] ss:$0 sm:$0xff] }
   0xd   : > { %s165_s17 = scalar_lea.vmem %s341_s0, %s275_s14  ;;  %s170_s24 = scalar_lea.vmem %s344_s3, %s275_s14 }
   0xe   : > { %v280_v0 = vld [vmem:[%s165_s17] sm:$0xff]  }
   0xf   : > { %v281_v2 = vunpack.c.l.bf16 %v280_v0  ;;  %v282_v3 = vunpack.c.h.bf16 %v280_v0 }
  0x11   : > { %v182_v5 = vmul.f32 %v281_v2, %v269_v1  ;;  %v183_v6 = vmul.f32 %v282_v3, %v269_v1 }
  0x13   : > { %v191_v7 = vadd.f32 %v270_v4, %v182_v5  ;;  %v192_v8 = vadd.f32 %v270_v4, %v183_v6 }
  0x15   : > { %v193_v9 = vmax.f32 %v191_v7, 0.0  ;;  %v194_v10 = vmax.f32 %v192_v8, 0.0 }
  0x17   : > { %v286_v11 = vpack.c.bf16 %v194_v10, %v193_v9 }
  0x19   : > { %287 = vst [vmem:[%s170_s24] sm:$0xff] %v286_v11  }
  0x1a PF: > { %s13_s12 = sadd.s32 1, %s302_s12  }
  0x1b   : > { %p10_p4 = scmp.ge.s32.totalorder %s13_s12, 4  }
  0x1d   :  { %12 = sbr.rel (!%p10_p4) target bundleno = 1 (0x1), region = 62 }

// kernel: resnet_forward.10
= control target key start
LH: loop header
LB: loop body
LE: loop exit
PB: predicated region body
PF: predicated region fallthrough
CT: control target
= control target key end

     0   :  { %s623_s15 = smov 0   ;;  %s672_s0 = inlined_call_operand.vmem [shape: bf16[2,16,4], index: 0, kind: input, shape index: {}]   ;;  %s673_s1 = inlined_call_operand.vmem [shape: bf16[12,128], index: 1, kind: input, shape index: {}]   ;;  %s674_s2 = inlined_call_operand.vmem [shape: f32[1,128], index: 2, kind: input, shape index: {}]   ;;  %s675_s3 = inlined_call_operand.vmem [shape: bf16[2,16,128], index: 3, kind: output, shape index: {0}]   ;;  %s676_s4 = inlined_call_operand.vmem [shape: f32[2,2,128], index: 4, kind: output, shape index: {1}]  }
   0x1 LB: > { %s522_s16 = sadd.s32 4294967295, %s594_s15   ;;  %p526_p0 = scmp.ge.s32.totalorder %s594_s15, 1  ;;  %s594_s15 = sphi %s623_s15, %s15_s15  }
   0x2   : > { %p165_p1 = scmp.lt.s32.totalorder %s594_s15, 3 }
   0x4   : > { %p166_p2 = pnand %p526_p0, %p165_p1 }
   0x5   : > { %p195_p3 = scmp.lt.s32.totalorder (!%p166_p2), %s522_s16, 1 }
   0x6   : > { %169 = sbr.rel (%p166_p2) target bundleno = 266 (0x10a), region = 32 }
   0xb   : > { %v585_v0 = vld [vmem:[%s673_s1] ss:$0 sps:$4 sm:$0xcc]   ;;  %v214_v1 = vlaneseq  ;;  %v596_v2 = vmov 0.0   ;;  %vm251_vm0 = vcmask 1041408   ;;  %vm597_vm1 = vmmov 0  }
   0xc   : > { %557 = vmatprep.subr.bf16.mxu0 %v596_v2  ;;  %563 = vmatprep.subr.bf16.mxu1 %v596_v2  ;;  %v246_v3 = vrot.slane %v585_v0, 2  ;;  %v236_v4 = vld [vmem:[%s673_s1] sm:$0x3]  ;;  %s678_s16 = smov (!%p195_p3, %s522_s16), 1  ;;  %v344_v8 = vld [vmem:[%s673_s1 + $0x4] sm:$0x3] }
   0xd   : > { %559 = vmatprep.mubr.msk.bf16.mxu0 %vm597_vm1, %v596_v2  ;;  %565 = vmatprep.mubr.msk.bf16.mxu1 %vm597_vm1, %v596_v2  ;;  %v215_v5 = vshrl.u32 %v214_v1, 7  ;;  %v300_v6 = vsel %vm251_vm0, %v236_v4, 0  ;;  %s542_s21 = sshll.u32 %s678_s16, 3  ;;  %vm247_vm2 = vcmask 31744   ;;  %v349_v13 = vsel %vm251_vm0, %v344_v8, 0  ;;  %s531_s6 = sshll.u32 %s678_s16, 1 }
   0xe   : > { %v253_v7 = vsel %vm251_vm0, %v246_v3, 0  ;;  %564 = vmatpush3.bf16.msra.mxu1 %v300_v6  ;;  %s199_s26 = scalar_lea.vmem %s672_s0, %s542_s21  ;;  %v537_v38 = vld [vmem:[%s674_s2] ss:$0 sm:$0xff]  ;;  %s204_s5 = scalar_lea.vmem %s675_s3, %s542_s21 }
   0xf   : > { %558 = vmatpush3.bf16.msra.mxu0 %v253_v7  ;;  %v216_v9 = vadd.s32 8, %v215_v5  ;;  %v210_v10 = vld [vmem:[%s199_s26] sm:$0xff]   ;;  %vm217_vm3 = vcmp.eq.s32.totalorder %v215_v5, 0  ;;  %vm221_vm4 = vcmp.lt.s32.totalorder %v215_v5, 1  ;;  %vm230_vm6 = vcmp.lt.s32.totalorder %v215_v5, 7  ;;  %s208_s9 = scalar_lea.vmem %s676_s4, %s531_s6 }
  0x10   : > { %569 = vmatprep.subr.bf16.mxu0 %v596_v2  ;;  %v212_v11 = vunpack.c.l.bf16 %v210_v10  ;;  %v213_v12 = vunpack.c.h.bf16 %v210_v10 }
  0x11   : > { %vm227_vm5 = vcmp.eq.s32.totalorder %v216_v9, 15 }
  0x12   : > { %v219_v14 = vrot.slane %v212_v11, 7  ;;  %v220_v15 = vrot.slane %v213_v12, 7  ;;  %v228_v16 = vrot.slane %v212_v11, 1  ;;  %v229_v17 = vrot.slane %v213_v12, 1  ;;  %560 = vmatmul.mubr.msk.bf16.vlgmr.msra.gmra.mxu0 %vm247_vm2, %v210_v10 }
  0x13   : > { %570 = vmatpush3.bf16.msra.mxu0 %v349_v13  ;;  %571 = vmatprep.mubr.msk.bf16.mxu0 %vm597_vm1, %v596_v2 }
  0x14   : > { %v222_v18 = vsel %vm221_vm4, %v219_v14, %v220_v15  ;;  %v223_v19 = vsel %vm221_vm4, %v220_v15, %v219_v14  ;;  %v231_v20 = vsel %vm230_vm6, %v228_v16, %v229_v17  ;;  %v232_v21 = vsel %vm230_vm6, %v229_v17, %v228_v16 }
  0x15   : > { %v224_v22 = vsel %vm217_vm3, 0.0, %v223_v19  ;;  %v234_v23 = vsel %vm227_vm5, 0.0, %v232_v21 }
  0x16   : > { %v235_v24 = vpack.c.bf16 %v222_v18, %v224_v22  ;;  %v343_v25 = vpack.c.bf16 %v234_v23, %v231_v20 }
  0x18   : > { %566 = vmatmul.mubr.msk.bf16.vlgmr.msra.gmra.mxu1 %vm247_vm2, %v235_v24 }
  0x1a   : > { %572 = vmatmul.mubr.msk.bf16.vlgmr.msra.gmra.mxu0 %vm247_vm2, %v343_v25 }
  0xd2   : > { %v289_v26 = vpop.f32.mrf.mxu0 }
  0xd4   : > { %v561_v27 = vpop.f32.mrf.mxu0 }
  0xd6   : > { %v292_v28 = vpop.f32.mrf.mxu0 }
  0xd8   : > { %v562_v29 = vpop.f32.mrf.mxu0  ;;  %v336_v30 = vpop.f32.mrf.mxu1 }
  0xd9   : > { %v337_v31 = vadd.f32 %v336_v30, %v289_v26 }
  0xda   : > { %v567_v32 = vpop.f32.mrf.mxu1  ;;  %v385_v33 = vpop.f32.mrf.mxu0 }
  0xdb   : > { %v392_v36 = vadd.f32 %v385_v33, %v337_v31 }
  0xdc   : > { %v339_v34 = vpop.f32.mrf.mxu1  ;;  %v573_v35 = vpop.f32.mrf.mxu0 }
  0xdd   : > { %v340_v37 = vadd.f32 %v339_v34, %v292_v28  ;;  %v401_v43 = vadd.f32 %v537_v38, %v392_v36 }
  0xde   : > { %v568_v39 = vpop.f32.mrf.mxu1  ;;  %v388_v40 = vpop.f32.mrf.mxu0 }
  0xdf   : > { %v393_v41 = vadd.f32 %v388_v40, %v340_v37 }
  0xe0   : > { %v574_v42 = vpop.f32.mrf.mxu0 }
  0xe1   : > { %v402_v44 = vadd.f32 %v537_v38, %v393_v41 }
  0xe3   : > { %v403_v45 = vpack.c.bf16 %v402_v44, %v401_v43 }
  0xe5   : > { %550 = vst [vmem:[%s204_s5] sm:$0xff] %v403_v45   ;;  %v413_v46 = vunpack.c.l.bf16 %v403_v45  ;;  %v414_v47 = vunpack.c.h.bf16 %v403_v45 }
  0xe7   : > { %v415_v48 = vadd.f32 %v414_v47, %v413_v46 }
  0xe9   : > { %v416_v49 = vrot.slane %v415_v48, 4 }
  0xeb   : > { %v417_v50 = vadd.f32 %v416_v49, %v415_v48 }
  0xed   : > { %v418_v51 = vrot.slane %v417_v50, 2 }
  0xef   : > { %v419_v52 = vadd.f32 %v418_v51, %v417_v50 }
  0xf1   : > { %v420_v53 = vrot.slane %v419_v52, 1 }
  0xf3   : > { %v421_v54 = vadd.f32 %v420_v53, %v419_v52 }
  0xf5   : > { %v422_v55 = vmul.f32 0.0625, %v421_v54  ;;  %434 = vst [vmem:[%s208_s9] sm:$0x1] %v421_v54 }
  0xf7   : > { %v423_v56 = vsub.f32 %v413_v46, %v422_v55  ;;  %v424_v57 = vsub.f32 %v414_v47, %v422_v55 }
  0xf9   : > { %v425_v58 = vmul.f32 %v423_v56, %v423_v56  ;;  %v426_v59 = vmul.f32 %v424_v57, %v424_v57 }
  0xfb   : > { %v427_v60 = vadd.f32 %v426_v59, %v425_v58 }
  0xfd   : > { %v428_v61 = vrot.slane %v427_v60, 4 }
  0xff   : > { %v429_v62 = vadd.f32 %v428_v61, %v427_v60 }
 0x101   : > { %v430_v63 = vrot.slane %v429_v62, 2 }
 0x103   : > { %v431_v0 = vadd.f32 %v430_v63, %v429_v62 }
 0x105   : > { %v432_v1 = vrot.slane %v431_v0, 1 }
 0x107   : > { %v433_v2 = vadd.f32 %v432_v1, %v431_v0 }
 0x109   : > { %435 = vst [vmem:[%s208_s9 + $0x1] sm:$0x1] %v433_v2 }
 0x10a PF: > { %s15_s15 = sadd.s32 1, %s594_s15  }
 0x10b   : > { %p12_p4 = scmp.ge.s32.totalorder %s15_s15, 4  }
 0x10d   :  { %14 = sbr.rel (!%p12_p4) target bundleno = 1 (0x1), region = 74 }

// kernel: resnet_forward.12
= control target key start
LH: loop header
LB: loop body
LE: loop exit
PB: predicated region body
PF: predicated region fallthrough
CT: control target
= control target key end

     0   :  { %s821_s15 = smov 0   ;;  %s941_s0 = inlined_call_operand.vmem [shape: bf16[2,16,128], index: 0, kind: input, shape index: {}]   ;;  %s942_s1 = inlined_call_operand.vmem [shape: bf16[384,128], index: 1, kind: input, shape index: {}]   ;;  %s943_s2 = inlined_call_operand.vmem [shape: f32[1,128], index: 2, kind: input, shape index: {}]   ;;  %s944_s3 = inlined_call_operand.vmem [shape: bf16[2,16,128], index: 3, kind: output, shape index: {0}]   ;;  %s945_s4 = inlined_call_operand.vmem [shape: f32[2,2,128], index: 4, kind: output, shape index: {1}]  }
   0x1 LB: > { %s638_s16 = sadd.s32 4294967295, %s791_s15   ;;  %p642_p0 = scmp.ge.s32.totalorder %s791_s15, 1  ;;  %s791_s15 = sphi %s821_s15, %s15_s15  }
   0x2   : > { %p165_p1 = scmp.lt.s32.totalorder %s791_s15, 3 }
   0x4   : > { %p166_p2 = pnand %p642_p0, %p165_p1 }
   0x5   : > { %p195_p3 = scmp.lt.s32.totalorder (!%p166_p2), %s638_s16, 1 }
   0x6   : > { %169 = sbr.rel (%p166_p2) target bundleno = 288 (0x120), region = 32 }
   0xb   : > { %v759_v0 = vld [vmem:[%s942_s1 + $0x78] sm:$0xff]   ;;  %v793_v1 = vmov 0.0   ;;  %v762_v4 = vld [vmem:[%s942_s1 + $0x70] sm:$0xff]   ;;  %vm794_vm0 = vmmov 0   ;;  %v765_v7 = vld [vmem:[%s942_s1 + $0x68] sm:$0xff]   ;;  %s947_s16 = smov (!%p195_p3, %s638_s16), 1  ;;  %v214_v17 = vlaneseq }
   0xc   : > { %728 = vmatprep.subr.bf16.mxu1 %v793_v1  ;;  %v760_v2 = vld [vmem:[%s942_s1 + $0x38] sm:$0xff]   ;;  %697 = vmatprep.subr.bf16.mxu0 %v759_v0  ;;  %v763_v5 = vld [vmem:[%s942_s1 + $0x30] sm:$0xff]   ;;  %v766_v8 = vld [vmem:[%s942_s1 + $0x28] sm:$0xff]   ;;  %s686_s27 = sshll.u32 %s947_s16, 3  ;;  %vm795_vm5 = vmmov 1   ;;  %s647_s26 = sshll.u32 %s947_s16, 1 }
   0xd   : > { %v761_v3 = vld [vmem:[%s942_s1 + $0xb8] sm:$0xff]   ;;  %698 = vmatpush3.bf16.msra.mxu0 %v760_v2  ;;  %744 = vmatprep.mubr.msk.bf16.mxu1 %vm794_vm0, %v793_v1  ;;  %v764_v6 = vld [vmem:[%s942_s1 + $0xb0] sm:$0xff]   ;;  %v767_v9 = vld [vmem:[%s942_s1 + $0xa8] sm:$0xff]   ;;  %v215_v21 = vshrl.u32 %v214_v17, 7  ;;  %s199_s8 = scalar_lea.vmem %s941_s0, %s686_s27  ;;  %s204_s25 = scalar_lea.vmem %s944_s3, %s686_s27 }
   0xe   : > { %729 = vmatpush3.bf16.msra.mxu1 %v761_v3  ;;  %699 = vmatprep.subr.bf16.mxu0 %v762_v4  ;;  %v768_v10 = vld [vmem:[%s942_s1 + $0x60] sm:$0xff]   ;;  %v771_v13 = vld [vmem:[%s942_s1 + $0x58] sm:$0xff]   ;;  %v774_v16 = vld [vmem:[%s942_s1 + $0x50] sm:$0xff]   ;;  %s208_s30 = scalar_lea.vmem %s945_s4, %s647_s26 }
   0xf   : > { %730 = vmatprep.subr.bf16.mxu1 %v793_v1  ;;  %v769_v11 = vld [vmem:[%s942_s1 + $0x20] sm:$0xff]   ;;  %v772_v14 = vld [vmem:[%s942_s1 + $0x18] sm:$0xff]   ;;  %v775_v18 = vld [vmem:[%s942_s1 + $0x10] sm:$0xff]   ;;  %v216_v26 = vadd.s32 8, %v215_v21  ;;  %vm221_vm1 = vcmp.lt.s32.totalorder %v215_v21, 1  ;;  %vm230_vm2 = vcmp.lt.s32.totalorder %v215_v21, 7 }
  0x10   : > { %v770_v12 = vld [vmem:[%s942_s1 + $0xa0] sm:$0xff]   ;;  %v773_v15 = vld [vmem:[%s942_s1 + $0x98] sm:$0xff]   ;;  %v776_v19 = vld [vmem:[%s942_s1 + $0x90] sm:$0xff]   ;;  %vm695_vm3 = vcmp.ne.s32.totalorder %v215_v21, 0 }
  0x11   : > { %700 = vmatpush3.bf16.msra.mxu0 %v763_v5  ;;  %v777_v20 = vld [vmem:[%s942_s1 + $0x48] sm:$0xff]   ;;  %v780_v24 = vld [vmem:[%s942_s1 + $0x40] sm:$0xff]   ;;  %vm696_vm4 = vcmp.ne.s32.totalorder %v216_v26, 15  ;;  %vm675_vm6 = vmpackc.low %vm795_vm5, %vm695_vm3 }
  0x12   : > { %731 = vmatpush3.bf16.msra.mxu1 %v764_v6  ;;  %701 = vmatprep.subr.bf16.mxu0 %v765_v7  ;;  %v778_v22 = vld [vmem:[%s942_s1 + $0x8] sm:$0xff]   ;;  %v210_v25 = vld [vmem:[%s199_s8] sm:$0xff]   ;;  %vm679_vm7 = vmpackc.low %vm696_vm4, %vm795_vm5 }
  0x13   : > { %732 = vmatprep.subr.bf16.mxu1 %v793_v1  ;;  %v779_v23 = vld [vmem:[%s942_s1 + $0x88] sm:$0xff]   ;;  %v212_v27 = vunpack.c.l.bf16 %v210_v25  ;;  %v213_v28 = vunpack.c.h.bf16 %v210_v25  ;;  %v781_v29 = vld [vmem:[%s942_s1] sm:$0xff]   ;;  %469 = vmatprep.mubr.bf16.mxu0 %v210_v25 }
  0x14   : > { %v782_v34 = vld [vmem:[%s942_s1 + $0x80] sm:$0xff]  }
  0x15   : > { %702 = vmatpush3.bf16.msra.mxu0 %v766_v8  ;;  %v219_v30 = vrot.slane %v212_v27, 7  ;;  %v220_v31 = vrot.slane %v213_v28, 7  ;;  %v228_v32 = vrot.slane %v212_v27, 1  ;;  %v229_v33 = vrot.slane %v213_v28, 1  ;;  %v649_v46 = vld [vmem:[%s943_s2] ss:$0 sm:$0xff] }
  0x16   : > { %733 = vmatpush3.bf16.msra.mxu1 %v767_v9  ;;  %703 = vmatprep.subr.bf16.mxu0 %v768_v10 }
  0x17   : > { %734 = vmatprep.subr.bf16.mxu1 %v793_v1  ;;  %v222_v35 = vsel %vm221_vm1, %v219_v30, %v220_v31  ;;  %v223_v36 = vsel %vm221_vm1, %v220_v31, %v219_v30  ;;  %v231_v37 = vsel %vm230_vm2, %v228_v32, %v229_v33  ;;  %v232_v38 = vsel %vm230_vm2, %v229_v33, %v228_v32 }
  0x18   : > { %v676_v39 = vpack.c.bf16 %v222_v35, %v223_v36  ;;  %v680_v40 = vpack.c.bf16 %v232_v38, %v231_v37 }
  0x19   : > { %704 = vmatpush3.bf16.msra.mxu0 %v769_v11 }
  0x1a   : > { %735 = vmatpush3.bf16.msra.mxu1 %v770_v12  ;;  %705 = vmatprep.subr.bf16.mxu0 %v771_v13 }
  0x1b   : > { %736 = vmatprep.subr.bf16.mxu1 %v793_v1 }
  0x1d   : > { %706 = vmatpush3.bf16.msra.mxu0 %v772_v14 }
  0x1e   : > { %737 = vmatpush3.bf16.msra.mxu1 %v773_v15  ;;  %707 = vmatprep.subr.bf16.mxu0 %v774_v16 }
  0x1f   : > { %738 = vmatprep.subr.bf16.mxu1 %v793_v1 }
  0x21   : > { %708 = vmatpush3.bf16.msra.mxu0 %v775_v18 }
  0x22   : > { %739 = vmatpush3.bf16.msra.mxu1 %v776_v19  ;;  %709 = vmatprep.subr.bf16.mxu0 %v777_v20 }
  0x23   : > { %740 = vmatprep.subr.bf16.mxu1 %v793_v1 }
  0x25   : > { %710 = vmatpush3.bf16.msra.mxu0 %v778_v22 }
  0x26   : > { %741 = vmatpush3.bf16.msra.mxu1 %v779_v23  ;;  %711 = vmatprep.subr.bf16.mxu0 %v780_v24 }
  0x27   : > { %742 = vmatprep.subr.bf16.mxu1 %v793_v1 }
  0x29   : > { %712 = vmatpush3.bf16.msra.mxu0 %v781_v29 }
  0x2a   : > { %743 = vmatpush3.bf16.msra.mxu1 %v782_v34 }
  0x2c   : > { %677 = vmatmul.mubr.msk.bf16.vlgmr.msra.gmra.mxu0 %vm675_vm6, %v676_v39 }
  0x2d   : > { %745 = vmatmul.mubr.msk.bf16.vlgmr.msra.gmra.mxu1 %vm679_vm7, %v680_v40 }
  0xec   : > { %v713_v41 = vpop.f32.mrf.mxu0 }
  0xed   : > { %v512_v42 = vpop.f32.mrf.mxu1 }
  0xee   : > { %v714_v43 = vpop.f32.mrf.mxu0 }
  0xef   : > { %v715_v44 = vadd.f32 %v714_v43, %v713_v41  ;;  %v746_v45 = vpop.f32.mrf.mxu1 }
  0xf0   : > { %v716_v47 = vpop.f32.mrf.mxu0 }
  0xf1   : > { %v515_v48 = vpop.f32.mrf.mxu1  ;;  %v472_v50 = vadd.f32 %v715_v44, %v649_v46 }
  0xf2   : > { %v717_v49 = vpop.f32.mrf.mxu0 }
  0xf3   : > { %v718_v51 = vadd.f32 %v717_v49, %v716_v47  ;;  %v747_v52 = vpop.f32.mrf.mxu1  ;;  %v513_v54 = vadd.f32 %v512_v42, %v472_v50 }
  0xf5   : > { %v475_v53 = vadd.f32 %v718_v51, %v649_v46 }
  0xf7   : > { %v516_v55 = vadd.f32 %v515_v48, %v475_v53 }
  0xf9   : > { %v519_v56 = vpack.c.bf16 %v516_v55, %v513_v54 }
  0xfb   : > { %694 = vst [vmem:[%s204_s25] sm:$0xff] %v519_v56   ;;  %v529_v57 = vunpack.c.l.bf16 %v519_v56  ;;  %v530_v58 = vunpack.c.h.bf16 %v519_v56 }
  0xfd   : > { %v531_v59 = vadd.f32 %v530_v58, %v529_v57 }
  0xff   : > { %v532_v60 = vrot.slane %v531_v59, 4 }
 0x101   : > { %v533_v61 = vadd.f32 %v532_v60, %v531_v59 }
 0x103   : > { %v534_v62 = vrot.slane %v533_v61, 2 }
 0x105   : > { %v535_v63 = vadd.f32 %v534_v62, %v533_v61 }
 0x107   : > { %v536_v0 = vrot.slane %v535_v63, 1 }
 0x109   : > { %v537_v1 = vadd.f32 %v536_v0, %v535_v63 }
 0x10b   : > { %v538_v2 = vmul.f32 0.0625, %v537_v1  ;;  %550 = vst [vmem:[%s208_s30] sm:$0x1] %v537_v1 }
 0x10d   : > { %v539_v3 = vsub.f32 %v529_v57, %v538_v2  ;;  %v540_v4 = vsub.f32 %v530_v58, %v538_v2 }
 0x10f   : > { %v541_v5 = vmul.f32 %v539_v3, %v539_v3  ;;  %v542_v6 = vmul.f32 %v540_v4, %v540_v4 }
 0x111   : > { %v543_v7 = vadd.f32 %v542_v6, %v541_v5 }
 0x113   : > { %v544_v8 = vrot.slane %v543_v7, 4 }
 0x115   : > { %v545_v9 = vadd.f32 %v544_v8, %v543_v7 }
 0x117   : > { %v546_v10 = vrot.slane %v545_v9, 2 }
 0x119   : > { %v547_v11 = vadd.f32 %v546_v10, %v545_v9 }
 0x11b   : > { %v548_v12 = vrot.slane %v547_v11, 1 }
 0x11d   : > { %v549_v13 = vadd.f32 %v548_v12, %v547_v11 }
 0x11f   : > { %551 = vst [vmem:[%s208_s30 + $0x1] sm:$0x1] %v549_v13 }
 0x120 PF: > { %s15_s15 = sadd.s32 1, %s791_s15  }
 0x121   : > { %p12_p4 = scmp.ge.s32.totalorder %s15_s15, 4  }
 0x123   :  { %14 = sbr.rel (!%p12_p4) target bundleno = 1 (0x1), region = 74 }

// kernel: resnet_forward.15
= control target key start
LH: loop header
LB: loop body
LE: loop exit
PB: predicated region body
PF: predicated region fallthrough
CT: control target
= control target key end

     0   :  { %s401_s15 = smov 0   ;;  %s427_s0 = inlined_call_operand.vmem [shape: bf16[2,16,128], index: 0, kind: input, shape index: {}]   ;;  %s428_s1 = inlined_call_operand.vmem [shape: f32[1,128], index: 1, kind: input, shape index: {}]   ;;  %s429_s2 = inlined_call_operand.vmem [shape: f32[1,128], index: 2, kind: input, shape index: {}]   ;;  %s430_s3 = inlined_call_operand.vmem [shape: bf16[2,16,128], index: 3, kind: input, shape index: {}]   ;;  %s431_s4 = inlined_call_operand.vmem [shape: bf16[2,16,128], index: 4, kind: output, shape index: {}]  }
   0x1 LB: > { %s325_s16 = sadd.s32 4294967295, %s374_s15   ;;  %p329_p0 = scmp.ge.s32.totalorder %s374_s15, 1  ;;  %s374_s15 = sphi %s401_s15, %s14_s15  }
   0x2   : > { %p172_p1 = scmp.lt.s32.totalorder %s374_s15, 3 }
   0x4   : > { %p173_p2 = pnand %p329_p0, %p172_p1 }
   0x5   : > { %p203_p3 = scmp.lt.s32.totalorder (!%p173_p2), %s325_s16, 1 }
   0x6   : > { %176 = sbr.rel (%p173_p2) target bundleno = 28 (0x1c), region = 36 }
   0xb   : > { %s433_s16 = smov (!%p203_p3, %s325_s16), 1  ;;  %v336_v1 = vld [vmem:[%s428_s1] ss:$0 sm:$0xff] }
   0xc   : > { %s342_s17 = sshll.u32 %s433_s16, 3  ;;  %v337_v5 = vld [vmem:[%s429_s2] ss:$0 sm:$0xff] }
   0xd   : > { %s207_s20 = scalar_lea.vmem %s427_s0, %s342_s17  ;;  %s212_s23 = scalar_lea.vmem %s430_s3, %s342_s17 }
   0xe   : > { %v348_v0 = vld [vmem:[%s207_s20] sm:$0xff]   ;;  %s217_s30 = scalar_lea.vmem %s431_s4, %s342_s17 }
   0xf   : > { %v352_v2 = vld [vmem:[%s212_s23] sm:$0xff]   ;;  %v349_v3 = vunpack.c.l.bf16 %v348_v0  ;;  %v350_v4 = vunpack.c.h.bf16 %v348_v0 }
  0x10   : > { %v353_v8 = vunpack.c.l.bf16 %v352_v2  ;;  %v354_v9 = vunpack.c.h.bf16 %v352_v2 }
  0x11   : > { %v229_v6 = vmul.f32 %v349_v3, %v336_v1  ;;  %v230_v7 = vmul.f32 %v350_v4, %v336_v1 }
  0x13   : > { %v238_v10 = vadd.f32 %v337_v5, %v229_v6  ;;  %v239_v11 = vadd.f32 %v337_v5, %v230_v7 }
  0x15   : > { %v244_v12 = vadd.f32 %v353_v8, %v238_v10  ;;  %v245_v13 = vadd.f32 %v354_v9, %v239_v11 }
  0x17   : > { %v246_v14 = vmax.f32 %v244_v12, 0.0  ;;  %v247_v15 = vmax.f32 %v245_v13, 0.0 }
  0x19   : > { %v358_v16 = vpack.c.bf16 %v247_v15, %v246_v14 }
  0x1b   : > { %359 = vst [vmem:[%s217_s30] sm:$0xff] %v358_v16  }
  0x1c PF: > { %s14_s15 = sadd.s32 1, %s374_s15  }
  0x1d   : > { %p11_p4 = scmp.ge.s32.totalorder %s14_s15, 4  }
  0x1f   :  { %13 = sbr.rel (!%p11_p4) target bundleno = 1 (0x1), region = 69 }

</bundles_post_ra>
